<compile_context>
chip_gen: v5e
topology: v5e:2x2
jax: 0.10.0
libtpu: 0.0.40
codegen_flags: <defaults>
</compile_context>

<pallas_src>
import jax
import jax.numpy as jnp
from jax.experimental import pallas as pl
from jax.experimental.pallas import tpu as pltpu

LANE = 128  # TPU vreg lane width


def cbow_kernel(idx_ref, emb_ref, w_ref, b_ref, out_ref):
    context = idx_ref.shape[0]
    emb_dim = emb_ref.shape[1]

    # Sum of context embeddings (the .sum(dim=0) in the PyTorch module).
    # Unrolled in-kernel gather: scalar index read from SMEM, dynamic row slice
    # of the resident embedding table, accumulated in vregs.
    acc = jnp.zeros((1, emb_dim), jnp.float32)
    for c in range(context):
        acc = acc + emb_ref[pl.ds(idx_ref[c], 1), :].astype(jnp.float32)

    # Linear layer: (1, D) @ (D, Vp) + (1, Vp).  Vp is lane-padded; pad columns
    # of W are zero and pad bias lanes are -1e30, so padded logits vanish under
    # the softmax.
    logits = (
        jnp.dot(acc, w_ref[...], preferred_element_type=jnp.float32) + b_ref[...]
    )

    # Numerically stable log_softmax over the vocab axis.
    m = jnp.max(logits, axis=-1, keepdims=True)
    shifted = logits - m
    lse = jnp.log(jnp.sum(jnp.exp(shifted), axis=-1, keepdims=True))
    out_ref[...] = (shifted - lse).astype(out_ref.dtype)


def cbow_forward(indices, emb_table, lin_w, lin_b):
    """indices: (context,) int32; emb_table: (V, D); lin_w: (V, D); lin_b: (V,).

    Returns (1, V) float32 log-probabilities, matching CBOW.forward.
    """
    vocab_size, emb_dim = emb_table.shape
    vp = ((vocab_size + LANE - 1) // LANE) * LANE  # lane-dense padded vocab

    # Pad vocab axis: zero weight columns, large-negative bias lanes (so the
    # padded logits contribute exp(..)=0 to the softmax and never win the max).
    w_t = jnp.zeros((emb_dim, vp), jnp.float32).at[:, :vocab_size].set(lin_w.T)
    b2d = jnp.full((1, vp), -1e30, jnp.float32).at[0, :vocab_size].set(lin_b)

    out_padded = pl.pallas_call(
        cbow_kernel,
        out_shape=jax.ShapeDtypeStruct((1, vp), jnp.float32),
        grid_spec=pltpu.PrefetchScalarGridSpec(
            num_scalar_prefetch=1,   # context indices -> SMEM
            grid=(1,),               # single step: no per-context-word overhead
            in_specs=[
                # full resident embedding table
                pl.BlockSpec((vocab_size, emb_dim), lambda i, idx: (0, 0)),
                # linear weight (pre-transposed, lane-padded) and bias
                pl.BlockSpec((emb_dim, vp), lambda i, idx: (0, 0)),
                pl.BlockSpec((1, vp), lambda i, idx: (0, 0)),
            ],
            out_specs=pl.BlockSpec((1, vp), lambda i, idx: (0, 0)),
        ),
        compiler_params=pltpu.CompilerParams(
            dimension_semantics=("arbitrary",),
        ),
    )(indices, emb_table, w_t, b2d)

    return out_padded[:, :vocab_size]


if __name__ == "__main__":
    raw_text = (
        "We are about to study the idea of a computational process.\n"
        "Computational processes are abstract beings that inhabit computers.\n"
        "As they evolve, processes manipulate other abstract things called data.\n"
        "The evolution of a process is directed by a pattern of rules\n"
        "called a program. People create programs to direct processes. In effect,\n"
        "we conjure the spirits of the computer with our spells."
    ).split()

    vocab = sorted(set(raw_text))  # deterministic ordering
    vocab_size = len(vocab)
    word_to_ix = {w: i for i, w in enumerate(vocab)}

    embedding_dim = 16
    context_size = 4  # window of 2 words on each side

    # Deterministic parameter init (synthetic; no checkpoint load).
    key = jax.random.PRNGKey(0)
    k_emb, k_w, k_b = jax.random.split(key, 3)
    emb_table = jax.random.normal(k_emb, (vocab_size, embedding_dim), jnp.float32)
    lin_w = jax.random.normal(k_w, (vocab_size, embedding_dim), jnp.float32) * 0.1
    lin_b = jax.random.normal(k_b, (vocab_size,), jnp.float32) * 0.1

    # Context for target word raw_text[2]: two words before and two after.
    context_words = [raw_text[0], raw_text[1], raw_text[3], raw_text[4]]
    indices = jnp.array([word_to_ix[w] for w in context_words], dtype=jnp.int32)

    out = cbow_forward(indices, emb_table, lin_w, lin_b)
    out = jax.block_until_ready(out)

    # Pure-JAX reference for correctness.
    embed_ref = jnp.take(emb_table, indices, axis=0).sum(axis=0).reshape(1, -1)
    logits_ref = embed_ref @ lin_w.T + lin_b
    ref = jax.nn.log_softmax(logits_ref, axis=1)

    assert out.shape == (1, vocab_size)
    assert bool(jnp.isfinite(out).all()), "non-finite values in output"
    assert jnp.allclose(out, ref, atol=1e-4, rtol=1e-4), "mismatch vs reference"

    print("KERNEL_OK")
</pallas_src>

<mosaic_0001>
module attributes {stable_mosaic.version = 11 : i64} {
  func.func @cbow_kernel(%arg0: i32, %arg1: memref<4xi32, #tpu.memory_space<smem>>, %arg2: memref<49x16xf32, #tpu.memory_space<vmem>>, %arg3: memref<16x128xf32, #tpu.memory_space<vmem>>, %arg4: memref<1x128xf32, #tpu.memory_space<vmem>>, %arg5: memref<1x128xf32, #tpu.memory_space<vmem>>) attributes {dimension_semantics = [#tpu.dimension_semantics<arbitrary>], iteration_bounds = array<i64: 1>, scalar_prefetch = 1 : i64, scratch_operands = 0 : i64, tpu.core_type = #tpu.core_type<tc>, window_params = [{pipeline_mode = #tpu.pipeline_mode<synchronous>, transform_indices = @transform_0, window_bounds = array<i64: 49, 16>}, {pipeline_mode = #tpu.pipeline_mode<synchronous>, transform_indices = @transform_1, window_bounds = array<i64: 16, 128>}, {pipeline_mode = #tpu.pipeline_mode<synchronous>, transform_indices = @transform_2, window_bounds = array<i64: 1, 128>}, {pipeline_mode = #tpu.pipeline_mode<synchronous>, transform_indices = @transform_3, window_bounds = array<i64: 1, 128>}]} {
    %cst = arith.constant 0.000000e+00 : f32
    %0 = vector.broadcast %cst : f32 to vector<1x16xf32>
    %c0 = arith.constant 0 : index
    %1 = memref.load %arg1[%c0] : memref<4xi32, #tpu.memory_space<smem>>
    %2 = arith.index_cast %1 : i32 to index
    %c0_0 = arith.constant 0 : index
    %3 = vector.load %arg2[%2, %c0_0] : memref<49x16xf32, #tpu.memory_space<vmem>>, vector<1x16xf32>
    %4 = arith.addf %0, %3 : vector<1x16xf32>
    %c1 = arith.constant 1 : index
    %5 = memref.load %arg1[%c1] : memref<4xi32, #tpu.memory_space<smem>>
    %6 = arith.index_cast %5 : i32 to index
    %c0_1 = arith.constant 0 : index
    %7 = vector.load %arg2[%6, %c0_1] : memref<49x16xf32, #tpu.memory_space<vmem>>, vector<1x16xf32>
    %8 = arith.addf %4, %7 : vector<1x16xf32>
    %c2 = arith.constant 2 : index
    %9 = memref.load %arg1[%c2] : memref<4xi32, #tpu.memory_space<smem>>
    %10 = arith.index_cast %9 : i32 to index
    %c0_2 = arith.constant 0 : index
    %11 = vector.load %arg2[%10, %c0_2] : memref<49x16xf32, #tpu.memory_space<vmem>>, vector<1x16xf32>
    %12 = arith.addf %8, %11 : vector<1x16xf32>
    %c3 = arith.constant 3 : index
    %13 = memref.load %arg1[%c3] : memref<4xi32, #tpu.memory_space<smem>>
    %14 = arith.index_cast %13 : i32 to index
    %c0_3 = arith.constant 0 : index
    %15 = vector.load %arg2[%14, %c0_3] : memref<49x16xf32, #tpu.memory_space<vmem>>, vector<1x16xf32>
    %16 = arith.addf %12, %15 : vector<1x16xf32>
    %c0_4 = arith.constant 0 : index
    %c0_5 = arith.constant 0 : index
    %17 = vector.load %arg3[%c0_4, %c0_5] : memref<16x128xf32, #tpu.memory_space<vmem>>, vector<16x128xf32>
    %cst_6 = arith.constant dense<0.000000e+00> : vector<1x128xf32>
    %18 = tpu.matmul %16, %17, %cst_6 {dimension_numbers = #tpu.dot_dimension_numbers<[1], [0], [0], [1], [0, 0, 1, 1], [], []>} : vector<1x16xf32>, vector<16x128xf32>, vector<1x128xf32> -> vector<1x128xf32>
    %c0_7 = arith.constant 0 : index
    %c0_8 = arith.constant 0 : index
    %19 = vector.load %arg4[%c0_7, %c0_8] : memref<1x128xf32, #tpu.memory_space<vmem>>, vector<1x128xf32>
    %20 = arith.addf %18, %19 : vector<1x128xf32>
    %cst_9 = arith.constant dense<0xFF800000> : vector<1xf32>
    %21 = vector.multi_reduction <maximumf>, %20, %cst_9 [1] : vector<1x128xf32> to vector<1xf32>
    %22 = vector.shape_cast %21 : vector<1xf32> to vector<1x1xf32>
    %23 = vector.broadcast %22 : vector<1x1xf32> to vector<1x128xf32>
    %24 = arith.subf %20, %23 : vector<1x128xf32>
    %25 = math.exp %24 : vector<1x128xf32>
    %cst_10 = arith.constant dense<0.000000e+00> : vector<1xf32>
    %26 = vector.multi_reduction <add>, %25, %cst_10 [1] : vector<1x128xf32> to vector<1xf32>
    %27 = vector.shape_cast %26 : vector<1xf32> to vector<1x1xf32>
    %28 = math.log %27 : vector<1x1xf32>
    %29 = vector.broadcast %28 : vector<1x1xf32> to vector<1x128xf32>
    %30 = arith.subf %24, %29 : vector<1x128xf32>
    %c0_11 = arith.constant 0 : index
    %c0_12 = arith.constant 0 : index
    %31 = vector.load %arg5[%c0_11, %c0_12] : memref<1x128xf32, #tpu.memory_space<vmem>>, vector<1x128xf32>
    tpu.vector_store %arg5[%c0_11, %c0_12], %30 {strides = array<i32>} : memref<1x128xf32, #tpu.memory_space<vmem>>, vector<1x128xf32>,
    return
  }
  func.func @transform_0(%arg0: i32, %arg1: memref<4xi32, #tpu.memory_space<smem>>) -> (i32, i32) {
    %c0_i32 = arith.constant 0 : i32
    %c0_i32_0 = arith.constant 0 : i32
    %c0_i32_1 = arith.constant 0 : i32
    return %c0_i32, %c0_i32_0 : i32, i32
  }
  func.func @transform_1(%arg0: i32, %arg1: memref<4xi32, #tpu.memory_space<smem>>) -> (i32, i32) {
    %c0_i32 = arith.constant 0 : i32
    %c0_i32_0 = arith.constant 0 : i32
    %c0_i32_1 = arith.constant 0 : i32
    return %c0_i32, %c0_i32_0 : i32, i32
  }
  func.func @transform_2(%arg0: i32, %arg1: memref<4xi32, #tpu.memory_space<smem>>) -> (i32, i32) {
    %c0_i32 = arith.constant 0 : i32
    %c0_i32_0 = arith.constant 0 : i32
    %c0_i32_1 = arith.constant 0 : i32
    return %c0_i32, %c0_i32_0 : i32, i32
  }
  func.func @transform_3(%arg0: i32, %arg1: memref<4xi32, #tpu.memory_space<smem>>) -> (i32, i32) {
    %c0_i32 = arith.constant 0 : i32
    %c0_i32_0 = arith.constant 0 : i32
    %c0_i32_1 = arith.constant 0 : i32
    return %c0_i32, %c0_i32_0 : i32, i32
  }
}

</mosaic_0001>

<bundles_post_ra>
// kernel: tpu_custom_call.1
= control target key start
LH: loop header
LB: loop body
LE: loop exit
PB: predicated region body
PF: predicated region fallthrough
CT: control target
= control target key end

     0   :  { %s151_s18 = smov [#allocation3]   ;;  %s205_s0 = inlined_call_operand.vmem [shape: s32[4], index: 0, kind: input, shape index: {}]   ;;  %s206_s1 = inlined_call_operand.vmem [shape: f32[49,16], index: 1, kind: input, shape index: {}]   ;;  %s207_s2 = inlined_call_operand.vmem [shape: f32[16,128], index: 2, kind: input, shape index: {}]   ;;  %s208_s3 = inlined_call_operand.vmem [shape: f32[1,128], index: 3, kind: input, shape index: {}]   ;;  %s209_s4 = inlined_call_operand.hbm [shape: f32[1,128], index: 4, kind: output, shape index: {}]  }
   0x1   :  { %s10_s17 = sshll.u32 %s205_s0, 4  ;;  %s11_s17 = int_to_ptr.vmem [resolvable:$true] %s10_s17 }
   0x2   :  { %13 = dma.vmem_to_smem %s11_s17, 16, %s151_s18, [#allocation2] }
   0x3   :  { %147 = dma.done.wait [#allocation2], 16 }
   0x4   :  { %148 = vsyncadd [#allocation2], 4294967280 }
   0x5   :  { %16 = sfence }
   0x6   :  { %v41_v0 = vld [vmem:[%s207_s2 + $0x8] sm:$0xff]  ;;  %v40_v1 = vld [vmem:[%s207_s2] sm:$0xff]  ;;  %s24_s23 = sld [smem:[#allocation3]] }
   0x7   :  { %61 = vmatpush.msra.mxu0 %v41_v0  ;;  %s101_s24 = sld [smem:[#allocation3 + $0x1]] }
   0x8   :  { %17 = vsyncpa [#allocation5], 0  ;;  %s102_s25 = sld [smem:[#allocation3 + $0x2]]  ;;  %vm43_vm0 = vcmask 130048   ;;  %v42_v9 = vld [vmem:[%s208_s3] sm:$0x1] }
   0x9   :  { %62 = vmatpush.msra.mxu0 %v40_v1  ;;  %s103_s0 = sld [smem:[#allocation3 + $0x3]]  ;;  %vm67_vm1 = vcmask 1040384   ;;  %s88_s3 = sshll.u32 %s209_s4, 4  ;;  %s89_s3 = int_to_ptr.hbm [resolvable:$true] %s88_s3 }
   0xc   :  { %s25_s28 = scalar_lea.vmem %s206_s1, %s24_s23 }
   0xd   :  { %v26_v2 = vld [vmem:[%s25_s28] sm:$0x1]  ;;  %s29_s5 = scalar_lea.vmem %s206_s1, %s101_s24 }
   0xe   :  { %v30_v3 = vld [vmem:[%s29_s5] sm:$0x1]  ;;  %s33_s2 = scalar_lea.vmem %s206_s1, %s102_s25 }
   0xf   :  { %v31_v4 = vadd.f32 %v30_v3, %v26_v2  ;;  %v34_v5 = vld [vmem:[%s33_s2] sm:$0x1]  ;;  %s37_s10 = scalar_lea.vmem %s206_s1, %s103_s0  ;;  %s152_s1 = smov [#allocation4]  }
  0x10   :  { %v38_v6 = vld [vmem:[%s37_s10] sm:$0x1]  ;;  %s86_s13 = sshll.u32 %s152_s1, 4  ;;  %s87_s13 = int_to_ptr.vmem [resolvable:$true] %s86_s13 }
  0x11   :  { %v35_v7 = vadd.f32 %v34_v5, %v31_v4 }
  0x13   :  { %v39_v8 = vadd.f32 %v38_v6, %v35_v7 }
  0x15   :  { %104 = vmatmul.msk.f32.vlgmr.msra.gmra.mxu0 %vm43_vm0, %v39_v8 }
  0x92   :  { %v64_v10 = vpop.f32.mrf.mxu0 }
  0x93   :  { %v65_v11 = vadd.f32 %v64_v10, %v42_v9 }
  0x95   :  { %v68_v12 = vsel %vm67_vm1, %v65_v11, -inf }
  0x96   :  { %69 = vmax.xlane.f32.xlu0 %v68_v12 }
 0x109   :  { %v70_v13 = vpop.xlane.xlu0 %69 }
 0x10a   :  { %v71_v14 = vsub.f32 %v65_v11, %v70_v13 }
 0x10c   :  { %v72_v15 = vmul.f32 1.442695, %v71_v14 }
 0x10e   :  { %107 = vpow2.f32 %v72_v15 }
 0x114   :  { %v108_v16 = vpop.eup %107 }
 0x115   :  { %v74_v17 = vsel %vm67_vm1, %v108_v16, 0.0 }
 0x116   :  { %75 = vadd.xlane.f32.xlu0 %v74_v17 }
 0x189   :  { %v76_v18 = vpop.xlane.xlu0 %75 }
 0x18a   :  { %109 = vlog2.f32 %v76_v18 }
 0x190   :  { %v110_v19 = vpop.eup %109 }
 0x191   :  { %v78_v20 = vmul.f32 0.6931472, %v110_v19 }
 0x193   :  { %v79_v21 = vsub.f32 %v71_v14, %v78_v20 }
 0x195   :  { %80 = vst [vmem:[#allocation4] sm:$0x1] %v79_v21 }
 0x196   :  { %91 = dma.vmem_to_hbm [thread:$0]  %s87_s13, 16, %s89_s3, [#allocation5]  }
 0x197   :  { %149 = dma.done.wait [#allocation5], 16  }
 0x198   :  { %150 = vsyncadd [#allocation5], 4294967280 }
 0x199   :  { %96 = vsyncpa [#allocation5], 1 }

</bundles_post_ra>
